<compile_context>
chip_gen: v6e
topology: v6e:2x2x1
jax: 0.10.0
libtpu: 0.0.40
codegen_flags: <defaults>
</compile_context>

<pallas_src>
import functools

import jax
import jax.numpy as jnp
from jax.experimental import pallas as pl
from jax.experimental.pallas import tpu as pltpu


def _round_up(n, m):
    return (n + m - 1) // m * m


def _make_kernel(KP, H1P, H2P, DOP):
    """Kernel over one (TM, KP) batch tile of x, the packed bf16 weight slab and f32 biases."""
    r2 = KP                    # start row of W2 block
    r3 = KP + H1P              # start row of W3 block (ends at r3 + H2P == R)

    def kernel(x_ref, p_ref, b_ref, o_ref):
        x = x_ref[...]                                           # (TM, KP) bf16

        # Linear 1 (sequence mean optionally pre-folded into W1) + ReLU.
        h1 = jnp.dot(x, p_ref[0:r2, 0:H1P],
                     preferred_element_type=jnp.float32)         # f32 accumulate
        h1 = jnp.maximum(h1 + b_ref[0:1, 0:H1P], 0.0)

        # Linear 2 + Dropout (identity in eval) + ReLU.
        # TODO(synk): training-mode dropout (pltpu.prng_seed + prng_random_bits
        # mask with 1/(1-p) scaling) is not implemented; matches eval/inference.
        h2 = jnp.dot(h1.astype(jnp.bfloat16), p_ref[r2:r3, 0:H2P],
                     preferred_element_type=jnp.float32)
        h2 = jnp.maximum(h2 + b_ref[1:2, 0:H2P], 0.0)

        # Linear 3 (lane-dense padded output); bias added post-accumulation in f32.
        out = jnp.dot(h2.astype(jnp.bfloat16), p_ref[r3:r3 + H2P, 0:DOP],
                      preferred_element_type=jnp.float32)
        o_ref[...] = (out + b_ref[2:3, 0:DOP]).astype(o_ref.dtype)

    return kernel


def pack_params(params, seq_len, *, fold_mean_bytes_limit=4 << 20):
    """Pack (w1,b1,w2,b2,w3,b3) into one bf16 lane-dense weight slab + an f32 bias block.

    If the replicated-W1 block stays small, the mean over the sequence axis is
    folded into W1 (tile w1/S S times, matching x.reshape(B, S*d_in)) so the
    reduction rides the MXU; otherwise the wrapper computes the mean.
    """
    w1, b1 = params["w1"], params["b1"].reshape(-1)
    w2, b2 = params["w2"], params["b2"].reshape(-1)
    w3, b3 = params["w3"], params["b3"].reshape(-1)
    d_in, h1 = w1.shape
    h2 = w2.shape[1]
    d_out = w3.shape[1]

    H1P = _round_up(h1, 128)
    H2P = _round_up(h2, 128)
    DOP = _round_up(d_out, 128)
    WMAX = max(H1P, H2P, DOP)   # equal widths in the shipped config -> no lane over-fetch

    # Mean-fold guard: only replicate W1 while the replicated block is small.
    fold_mean = (seq_len * d_in) * WMAX * 2 <= fold_mean_bytes_limit
    if fold_mean:
        KP = _round_up(seq_len * d_in, 128)
        w1_blk = jnp.tile(w1.astype(jnp.float32) / seq_len, (seq_len, 1))  # (S*d_in, h1)
    else:
        KP = _round_up(d_in, 128)
        w1_blk = w1.astype(jnp.float32)

    R = KP + H1P + H2P
    slab = jnp.zeros((R, WMAX), jnp.float32)
    slab = slab.at[:w1_blk.shape[0], :h1].set(w1_blk)
    slab = slab.at[KP:KP + h1, :h2].set(w2.astype(jnp.float32))
    slab = slab.at[KP + H1P:KP + H1P + h2, :d_out].set(w3.astype(jnp.float32))
    slab = slab.astype(jnp.bfloat16)          # bf16 operands: ~3x MXU rate, half the bytes

    bias = jnp.zeros((8, WMAX), jnp.float32)  # 8-row sublane-aligned f32 bias block
    bias = bias.at[0, :h1].set(b1.astype(jnp.float32))
    bias = bias.at[1, :h2].set(b2.astype(jnp.float32))
    bias = bias.at[2, :d_out].set(b3.astype(jnp.float32))

    slab_bytes = R * WMAX * 2
    # v7x has only 64 MiB VMEM per TensorCore; keep the resident slab well under half.
    assert slab_bytes <= (24 << 20), (
        f"packed weight slab ({slab_bytes} B) too large for v7x VMEM; "
        "disable the mean fold or tile the weights over a K/H grid axis")

    meta = dict(KP=KP, H1P=H1P, H2P=H2P, DOP=DOP, WMAX=WMAX, R=R,
                d_in=d_in, d_out=d_out, seq_len=seq_len, fold_mean=fold_mean)
    return slab, bias, meta


@functools.partial(jax.jit, static_argnames=("KP", "H1P", "H2P", "DOP", "WMAX", "R",
                                             "d_in", "d_out", "seq_len", "fold_mean"))
def _forward_packed(x, slab, bias, *, KP, H1P, H2P, DOP, WMAX, R,
                    d_in, d_out, seq_len, fold_mean):
    B, S, D_IN = x.shape
    assert S == seq_len and D_IN == d_in

    if fold_mean:
        x2d = x.reshape(B, S * D_IN)       # mean folded into W1 (w1/S tiled S times)
        cols = S * D_IN
    else:
        x2d = x.mean(axis=1)               # wrapper mean: S-fold fewer streamed bytes
        cols = D_IN
    x2d = x2d.astype(jnp.bfloat16)

    # One batch tile covering all rows (8-row granularity), capped at 512.
    # For larger B, split into >=2 parallel steps so v7x's two TensorCores can
    # share the batch (one extra ~0.35us grid step on 1-TC chips, negligible).
    TM = _round_up(B, 8)
    if B >= 128:
        TM = _round_up(pl.cdiv(B, 2), 8)
    TM = min(TM, 512)
    Bp = _round_up(B, TM)

    if Bp != B or cols != KP:
        # Feature-dim padding must be real zeros (ReLU/matmul correctness).
        x2d = jnp.pad(x2d, ((0, Bp - B), (0, KP - cols)))

    # Explicit VMEM budget: double-buffered x tile + slab + bias + out tile.
    vmem_need = 2 * (TM * KP * 2 + R * WMAX * 2 + 8 * WMAX * 4 + TM * DOP * 4)
    vmem_limit = min(max(2 * vmem_need, 16 << 20), 64 << 20)
    assert vmem_need <= vmem_limit

    kernel = _make_kernel(KP, H1P, H2P, DOP)
    out = pl.pallas_call(
        kernel,
        out_shape=jax.ShapeDtypeStruct((Bp, DOP), jnp.float32),
        grid=(Bp // TM,),
        in_specs=[
            pl.BlockSpec((TM, KP), lambda i: (i, 0)),      # streaming bf16 batch tiles of x
            pl.BlockSpec((R, WMAX), lambda i: (0, 0)),     # packed bf16 weights, grid-invariant
            pl.BlockSpec((8, WMAX), lambda i: (0, 0)),     # f32 biases, grid-invariant
        ],
        out_specs=pl.BlockSpec((TM, DOP), lambda i: (i, 0)),
        compiler_params=pltpu.CompilerParams(
            dimension_semantics=("parallel",),             # batch steps are independent
            vmem_limit_bytes=vmem_limit,
        ),
    )(x2d, slab, bias)
    return out[:B, :d_out]


def linear_module_forward(x, slab, bias, meta):
    """x: (B, S, D_in). slab/bias/meta from pack_params. Returns (B, D_out)."""
    return _forward_packed(x, slab, bias, **meta)


def init_params(key, d_in, h1, h2, d_out):
    """Deterministic synthetic parameter init (nn.Linear shapes, W stored (in, out))."""
    k1, k2, k3, k4, k5, k6 = jax.random.split(key, 6)

    def lin(kw, kb, fan_in, fan_out):
        bound = 1.0 / jnp.sqrt(fan_in)
        w = jax.random.uniform(kw, (fan_in, fan_out), jnp.float32, -bound, bound)
        b = jax.random.uniform(kb, (1, fan_out), jnp.float32, -bound, bound)
        return w, b

    w1, b1 = lin(k1, k2, d_in, h1)
    w2, b2 = lin(k3, k4, h1, h2)
    w3, b3 = lin(k5, k6, h2, d_out)
    return {"w1": w1, "b1": b1, "w2": w2, "b2": b2, "w3": w3, "b3": b3}


if __name__ == "__main__":
    # config = {'input': 32, 'h1': 64, 'h2': 32, 'output': 16, 'dropout': 0.1}
    B, S, D_IN, H1, H2, D_OUT = 2, 8, 32, 64, 32, 16

    key = jax.random.PRNGKey(0)
    kx, kp = jax.random.split(key)
    x = jax.random.normal(kx, (B, S, D_IN), jnp.float32)
    params = init_params(kp, D_IN, H1, H2, D_OUT)

    slab, bias, meta = pack_params(params, seq_len=S)
    out = linear_module_forward(x, slab, bias, meta)
    jax.block_until_ready(out)

    # Pure-JAX f32 reference (eval-mode dropout == identity). Kernel uses bf16
    # weights/activations with f32 accumulation -> loosened tolerance.
    xm = x.mean(axis=1)
    h = jnp.maximum(xm @ params["w1"] + params["b1"], 0.0)
    h = jnp.maximum(h @ params["w2"] + params["b2"], 0.0)
    ref = h @ params["w3"] + params["b3"]
    assert out.shape == (B, D_OUT)
    err = float(jnp.max(jnp.abs(out - ref)))
    assert jnp.allclose(out, ref, atol=2e-2, rtol=2e-2), err

    print("KERNEL_OK")
</pallas_src>

<mosaic_0001>
module attributes {stable_mosaic.version = 11 : i64} {
  func.func @kernel(%arg0: i32, %arg1: memref<8x256xbf16, #tpu.memory_space<vmem>>, %arg2: memref<512x128xbf16, #tpu.memory_space<vmem>>, %arg3: memref<8x128xf32, #tpu.memory_space<vmem>>, %arg4: memref<8x128xf32, #tpu.memory_space<vmem>>) attributes {dimension_semantics = [#tpu.dimension_semantics<parallel>], iteration_bounds = array<i64: 1>, scalar_prefetch = 0 : i64, scratch_operands = 0 : i64, tpu.core_type = #tpu.core_type<tc>, window_params = [{transform_indices = @transform_0, window_bounds = array<i64: 8, 256>}, {pipeline_mode = #tpu.pipeline_mode<synchronous>, transform_indices = @transform_1, window_bounds = array<i64: 512, 128>}, {pipeline_mode = #tpu.pipeline_mode<synchronous>, transform_indices = @transform_2, window_bounds = array<i64: 8, 128>}, {transform_indices = @transform_3, window_bounds = array<i64: 8, 128>}]} {
    %c0 = arith.constant 0 : index
    %c0_0 = arith.constant 0 : index
    %0 = vector.load %arg1[%c0, %c0_0] : memref<8x256xbf16, #tpu.memory_space<vmem>>, vector<8x256xbf16>
    %c0_1 = arith.constant 0 : index
    %c0_2 = arith.constant 0 : index
    %1 = vector.load %arg2[%c0_1, %c0_2] : memref<512x128xbf16, #tpu.memory_space<vmem>>, vector<256x128xbf16>
    %cst = arith.constant dense<0.000000e+00> : vector<8x128xf32>
    %2 = tpu.matmul %0, %1, %cst {dimension_numbers = #tpu.dot_dimension_numbers<[1], [0], [0], [1], [0, 0, 1, 1], [], []>} : vector<8x256xbf16>, vector<256x128xbf16>, vector<8x128xf32> -> vector<8x128xf32>
    %c0_3 = arith.constant 0 : index
    %c0_4 = arith.constant 0 : index
    %3 = vector.load %arg3[%c0_3, %c0_4] : memref<8x128xf32, #tpu.memory_space<vmem>>, vector<1x128xf32>
    %4 = vector.broadcast %3 : vector<1x128xf32> to vector<8x128xf32>
    %5 = arith.addf %2, %4 : vector<8x128xf32>
    %cst_5 = arith.constant 0.000000e+00 : f32
    %6 = vector.broadcast %cst_5 : f32 to vector<8x128xf32>
    %7 = arith.maximumf %5, %6 : vector<8x128xf32>
    %8 = arith.truncf %7 : vector<8x128xf32> to vector<8x128xbf16>
    %c256 = arith.constant 256 : index
    %c0_6 = arith.constant 0 : index
    %9 = vector.load %arg2[%c256, %c0_6] : memref<512x128xbf16, #tpu.memory_space<vmem>>, vector<128x128xbf16>
    %cst_7 = arith.constant dense<0.000000e+00> : vector<8x128xf32>
    %10 = tpu.matmul %8, %9, %cst_7 {dimension_numbers = #tpu.dot_dimension_numbers<[1], [0], [0], [1], [0, 0, 1, 1], [], []>} : vector<8x128xbf16>, vector<128x128xbf16>, vector<8x128xf32> -> vector<8x128xf32>
    %c1 = arith.constant 1 : index
    %c0_8 = arith.constant 0 : index
    %11 = vector.load %arg3[%c1, %c0_8] : memref<8x128xf32, #tpu.memory_space<vmem>>, vector<1x128xf32>
    %12 = vector.broadcast %11 : vector<1x128xf32> to vector<8x128xf32>
    %13 = arith.addf %10, %12 : vector<8x128xf32>
    %cst_9 = arith.constant 0.000000e+00 : f32
    %14 = vector.broadcast %cst_9 : f32 to vector<8x128xf32>
    %15 = arith.maximumf %13, %14 : vector<8x128xf32>
    %16 = arith.truncf %15 : vector<8x128xf32> to vector<8x128xbf16>
    %c384 = arith.constant 384 : index
    %c0_10 = arith.constant 0 : index
    %17 = vector.load %arg2[%c384, %c0_10] : memref<512x128xbf16, #tpu.memory_space<vmem>>, vector<128x128xbf16>
    %cst_11 = arith.constant dense<0.000000e+00> : vector<8x128xf32>
    %18 = tpu.matmul %16, %17, %cst_11 {dimension_numbers = #tpu.dot_dimension_numbers<[1], [0], [0], [1], [0, 0, 1, 1], [], []>} : vector<8x128xbf16>, vector<128x128xbf16>, vector<8x128xf32> -> vector<8x128xf32>
    %c2 = arith.constant 2 : index
    %c0_12 = arith.constant 0 : index
    %19 = vector.load %arg3[%c2, %c0_12] : memref<8x128xf32, #tpu.memory_space<vmem>>, vector<1x128xf32>
    %20 = vector.broadcast %19 : vector<1x128xf32> to vector<8x128xf32>
    %21 = arith.addf %18, %20 : vector<8x128xf32>
    %c0_13 = arith.constant 0 : index
    %c0_14 = arith.constant 0 : index
    %22 = vector.load %arg4[%c0_13, %c0_14] : memref<8x128xf32, #tpu.memory_space<vmem>>, vector<8x128xf32>
    tpu.vector_store %arg4[%c0_13, %c0_14], %21 {strides = array<i32>} : memref<8x128xf32, #tpu.memory_space<vmem>>, vector<8x128xf32>,
    return
  }
  func.func @transform_0(%arg0: i32) -> (i32, i32) {
    %c0_i32 = arith.constant 0 : i32
    %c0_i32_0 = arith.constant 0 : i32
    return %arg0, %c0_i32 : i32, i32
  }
  func.func @transform_1(%arg0: i32) -> (i32, i32) {
    %c0_i32 = arith.constant 0 : i32
    %c0_i32_0 = arith.constant 0 : i32
    %c0_i32_1 = arith.constant 0 : i32
    return %c0_i32, %c0_i32_0 : i32, i32
  }
  func.func @transform_2(%arg0: i32) -> (i32, i32) {
    %c0_i32 = arith.constant 0 : i32
    %c0_i32_0 = arith.constant 0 : i32
    %c0_i32_1 = arith.constant 0 : i32
    return %c0_i32, %c0_i32_0 : i32, i32
  }
  func.func @transform_3(%arg0: i32) -> (i32, i32) {
    %c0_i32 = arith.constant 0 : i32
    %c0_i32_0 = arith.constant 0 : i32
    return %arg0, %c0_i32 : i32, i32
  }
}

</mosaic_0001>

<bundles_post_ra>
// kernel: _forward_packed.1
= control target key start
LH: loop header
LB: loop body
LE: loop exit
PB: predicated region body
PF: predicated region fallthrough
CT: control target
= control target key end

     0   :  { %8 = vsyncpa [#allocation3], 0  ;;  %s616_s12 = smov [#allocation2]   ;;  %s677_s0 = inlined_call_operand.vmem [shape: bf16[8,256], index: 0, kind: input, shape index: {}]   ;;  %s678_s1 = inlined_call_operand.hbm [shape: bf16[512,128], index: 1, kind: input, shape index: {}]   ;;  %s679_s2 = inlined_call_operand.vmem [shape: f32[8,128], index: 2, kind: input, shape index: {}]   ;;  %s680_s3 = inlined_call_operand.vmem [shape: f32[8,128], index: 3, kind: output, shape index: {}]  }
   0x1   :  { %s16_s13 = sshll.u32 %s616_s12, 4  ;;  %s17_s13 = int_to_ptr.vmem [resolvable:$true] %s16_s13 }
   0x2   :  { %s602_s14 = scalar_lea.vmem %s17_s13, 4096  ;;  %p607_p1 = scmp.lt.s32.totalorder %s17_s13, %s17_s13 }
   0x3   :  { %p603_p0 = scmp.ne.s32.totalorder %s17_s13, %s602_s14  ;;  %p608_p2 = scmp.lt.s32.totalorder %s602_s14, %s602_s14 }
   0x5   :  { %p609_p3 = por %p608_p2, %p607_p1 }
   0x7   :  { %p610_p4 = pnand %p609_p3, %p603_p0 }
   0x9   :  { %613 = shalt.err (!%p610_p4)
}
   0xa   :  { %s617_s15 = smov 64   ;;  %s618_s16 = smov 4  }
   0xb   :  { %22 = dma.hbm_to_vmem [thread:$0]  %s678_s1, 4096, %s17_s13, [#allocation3], %s617_s15, %s617_s15, %s618_s16  }
   0xc   :  { %614 = dma.done.wait [#allocation3], 4096  }
   0xd   :  { %615 = vsyncadd [#allocation3], 4294963200  ;;  %v619_v0 = vmov 0.0   ;;  %v560_v1 = vld [vmem:[#allocation2 + $0x78] sm:$0xff]   ;;  %v562_v3 = vld [vmem:[#allocation2 + $0x70] sm:$0xff]   ;;  %vm620_vm0 = vmmov 0  }
   0xe   :  { %515 = vmatprep.subr.bf16.mxu1 %v619_v0  ;;  %v561_v2 = vld [vmem:[#allocation2 + $0x38] sm:$0xff]   ;;  %475 = vmatprep.subr.bf16.mxu0 %v560_v1  ;;  %v563_v4 = vld [vmem:[#allocation2 + $0x30] sm:$0xff]   ;;  %v564_v5 = vld [vmem:[#allocation2 + $0x68] sm:$0xff]  }
   0xf   :  { %476 = vmatpush3.bf16.msra.mxu0 %v561_v2  ;;  %v565_v6 = vld [vmem:[#allocation2 + $0x28] sm:$0xff]   ;;  %v566_v7 = vld [vmem:[#allocation2 + $0x60] sm:$0xff]   ;;  %v568_v9 = vld [vmem:[#allocation2 + $0x58] sm:$0xff]   ;;  %531 = vmatprep.mubr.msk.bf16.mxu1 %vm620_vm0, %v619_v0 }
  0x10   :  { %477 = vmatprep.subr.bf16.mxu0 %v562_v3  ;;  %v567_v8 = vld [vmem:[#allocation2 + $0x20] sm:$0xff]   ;;  %v569_v10 = vld [vmem:[#allocation2 + $0x18] sm:$0xff]   ;;  %v570_v11 = vld [vmem:[#allocation2 + $0x50] sm:$0xff]  }
  0x11   :  { %v29_v12 = vld [vmem:[%s677_s0] sm:$0xff]  ;;  %v578_v14 = vld [vmem:[#allocation2 + $0xb8] sm:$0xff]   ;;  %v571_v15 = vld [vmem:[#allocation2 + $0x10] sm:$0xff]  }
  0x12   :  { %v440_v13 = vcombine.high %v29_v12, %v29_v12  ;;  %v572_v16 = vld [vmem:[#allocation2 + $0x48] sm:$0xff]   ;;  %516 = vmatpush3.bf16.msra.mxu1 %v578_v14  ;;  %v579_v17 = vld [vmem:[#allocation2 + $0xb0] sm:$0xff]   ;;  %v574_v19 = vld [vmem:[#allocation2 + $0x40] sm:$0xff]   ;;  %v439_v23 = vcombine.low %v29_v12, %v29_v12 }
  0x13   :  { %478 = vmatpush3.bf16.msra.mxu0 %v563_v4  ;;  %v573_v18 = vld [vmem:[#allocation2 + $0x8] sm:$0xff]   ;;  %517 = vmatprep.subr.bf16.mxu1 %v619_v0  ;;  %v575_v21 = vld [vmem:[#allocation2] sm:$0xff]   ;;  %v582_v24 = vld [vmem:[#allocation2 + $0x98] sm:$0xff]  }
  0x14   :  { %479 = vmatprep.subr.bf16.mxu0 %v564_v5  ;;  %202 = vmatprep.mubr.bf16.mxu0 %v440_v13  ;;  %v580_v20 = vld [vmem:[#allocation2 + $0xa8] sm:$0xff]   ;;  %v581_v22 = vld [vmem:[#allocation2 + $0xa0] sm:$0xff]   ;;  %v583_v25 = vld [vmem:[#allocation2 + $0x90] sm:$0xff]  }
  0x15   :  { %v584_v26 = vld [vmem:[#allocation2 + $0x88] sm:$0xff]   ;;  %v585_v27 = vld [vmem:[#allocation2 + $0x80] sm:$0xff]   ;;  %v586_v28 = vld [vmem:[#allocation2 + $0xf8] sm:$0xff]  }
  0x16   :  { %518 = vmatpush3.bf16.msra.mxu1 %v579_v17  ;;  %v587_v29 = vld [vmem:[#allocation2 + $0xf0] sm:$0xff]   ;;  %v588_v30 = vld [vmem:[#allocation2 + $0xe8] sm:$0xff]   ;;  %v589_v31 = vld [vmem:[#allocation2 + $0xe0] sm:$0xff]  }
  0x17   :  { %480 = vmatpush3.bf16.msra.mxu0 %v565_v6  ;;  %519 = vmatprep.subr.bf16.mxu1 %v619_v0  ;;  %v590_v32 = vld [vmem:[#allocation2 + $0xd8] sm:$0xff]   ;;  %v591_v33 = vld [vmem:[#allocation2 + $0xd0] sm:$0xff]   ;;  %v438_v35 = vld [vmem:[%s679_s2] ss:$0 sm:$0xff] }
  0x18   :  { %481 = vmatprep.subr.bf16.mxu0 %v566_v7  ;;  %v592_v43 = vld [vmem:[#allocation2 + $0xc8] sm:$0xff]   ;;  %v593_v44 = vld [vmem:[#allocation2 + $0xc0] sm:$0xff]  }
  0x19   :  { %v457_v45 = vld [vmem:[%s679_s2 + $0x1] ss:$0 sm:$0xff]  ;;  %v466_v53 = vld [vmem:[%s679_s2 + $0x2] ss:$0 sm:$0xff] }
  0x1a   :  { %520 = vmatpush3.bf16.msra.mxu1 %v580_v20 }
  0x1b   :  { %482 = vmatpush3.bf16.msra.mxu0 %v567_v8  ;;  %521 = vmatprep.subr.bf16.mxu1 %v619_v0 }
  0x1c   :  { %483 = vmatprep.subr.bf16.mxu0 %v568_v9 }
  0x1e   :  { %522 = vmatpush3.bf16.msra.mxu1 %v581_v22 }
  0x1f   :  { %484 = vmatpush3.bf16.msra.mxu0 %v569_v10  ;;  %523 = vmatprep.subr.bf16.mxu1 %v619_v0 }
  0x20   :  { %485 = vmatprep.subr.bf16.mxu0 %v570_v11 }
  0x22   :  { %524 = vmatpush3.bf16.msra.mxu1 %v582_v24 }
  0x23   :  { %486 = vmatpush3.bf16.msra.mxu0 %v571_v15  ;;  %525 = vmatprep.subr.bf16.mxu1 %v619_v0 }
  0x24   :  { %487 = vmatprep.subr.bf16.mxu0 %v572_v16 }
  0x26   :  { %526 = vmatpush3.bf16.msra.mxu1 %v583_v25 }
  0x27   :  { %488 = vmatpush3.bf16.msra.mxu0 %v573_v18  ;;  %527 = vmatprep.subr.bf16.mxu1 %v619_v0 }
  0x28   :  { %489 = vmatprep.subr.bf16.mxu0 %v574_v19 }
  0x2a   :  { %528 = vmatpush3.bf16.msra.mxu1 %v584_v26 }
  0x2b   :  { %490 = vmatpush3.bf16.msra.mxu0 %v575_v21  ;;  %529 = vmatprep.subr.bf16.mxu1 %v619_v0 }
  0x2c   :  { %535 = vmatprep.subr.bf16.mxu0 %v619_v0 }
  0x2e   :  { %203 = vmatmul.mubr.bf16.vlgmr.msra.gmra.mxu0 %v439_v23  ;;  %530 = vmatpush3.bf16.msra.mxu1 %v585_v27 }
  0x2f   :  { %551 = vmatprep.mubr.msk.bf16.mxu0 %vm620_vm0, %v619_v0  ;;  %536 = vmatpush3.bf16.msra.mxu0 %v586_v28 }
  0x30   :  { %537 = vmatprep.subr.bf16.mxu0 %v619_v0 }
  0x33   :  { %538 = vmatpush3.bf16.msra.mxu0 %v587_v29 }
  0x34   :  { %539 = vmatprep.subr.bf16.mxu0 %v619_v0 }
  0x37   :  { %540 = vmatpush3.bf16.msra.mxu0 %v588_v30 }
  0x38   :  { %541 = vmatprep.subr.bf16.mxu0 %v619_v0 }
  0x3b   :  { %542 = vmatpush3.bf16.msra.mxu0 %v589_v31 }
  0x3c   :  { %543 = vmatprep.subr.bf16.mxu0 %v619_v0 }
  0x3f   :  { %544 = vmatpush3.bf16.msra.mxu0 %v590_v32 }
  0x40   :  { %545 = vmatprep.subr.bf16.mxu0 %v619_v0 }
  0x43   :  { %546 = vmatpush3.bf16.msra.mxu0 %v591_v33 }
  0x44   :  { %547 = vmatprep.subr.bf16.mxu0 %v619_v0 }
  0x47   :  { %548 = vmatpush3.bf16.msra.mxu0 %v592_v43 }
  0x48   :  { %549 = vmatprep.subr.bf16.mxu0 %v619_v0 }
  0x4b   :  { %550 = vmatpush3.bf16.msra.mxu0 %v593_v44 }
  0xee   :  { %v491_v34 = vpop.f32.mrf.mxu0 }
  0xf0   :  { %v492_v36 = vpop.f32.mrf.mxu0 }
  0xf1   :  { %v493_v37 = vadd.f32 %v492_v36, %v491_v34 }
  0xf2   :  { %v494_v38 = vpop.f32.mrf.mxu0 }
  0xf3   :  { %v205_v39 = vadd.f32 %v493_v37, %v438_v35 }
  0xf4   :  { %v495_v40 = vpop.f32.mrf.mxu0 }
  0xf5   :  { %v210_v41 = vmax.f32 %v205_v39, 0.0 }
  0xf7   :  { %v211_v42 = vpack.c.bf16 %v210_v41, %v210_v41 }
  0xf9   :  { %532 = vmatmul.mubr.bf16.vlgmr.msra.gmra.mxu1 %v211_v42 }
 0x1b9   :  { %v315_v46 = vpop.f32.mrf.mxu1 }
 0x1ba   :  { %v316_v47 = vadd.f32 %v457_v45, %v315_v46 }
 0x1bb   :  { %v533_v48 = vpop.f32.mrf.mxu1 }
 0x1bc   :  { %v321_v49 = vmax.f32 %v316_v47, 0.0 }
 0x1bd   :  { %v318_v50 = vpop.f32.mrf.mxu1 }
 0x1be   :  { %v322_v51 = vpack.c.bf16 %v321_v49, %v321_v49 }
 0x1bf   :  { %v534_v52 = vpop.f32.mrf.mxu1 }
 0x1c0   :  { %552 = vmatmul.mubr.bf16.vlgmr.msra.gmra.mxu0 %v322_v51 }
 0x280   :  { %v426_v54 = vpop.f32.mrf.mxu0 }
 0x281   :  { %v427_v55 = vadd.f32 %v466_v53, %v426_v54 }
 0x282   :  { %v553_v56 = vpop.f32.mrf.mxu0 }
 0x283   :  { %432 = vst [vmem:[%s680_s3] sm:$0xff] %v427_v55 }
 0x284   :  { %v429_v57 = vpop.f32.mrf.mxu0 }
 0x286   :  { %v554_v58 = vpop.f32.mrf.mxu0 }
 0x287   :  { %437 = vsyncpa [#allocation3], 1 }

</bundles_post_ra>
